<compile_context>
chip_gen: v7x
topology: tpu7x:2x2x1
jax: 0.10.0
libtpu: 0.0.40
codegen_flags: <defaults>
</compile_context>

<pallas_src>
import functools

import jax
import jax.numpy as jnp
from jax import lax
from jax.experimental import pallas as pl
from jax.experimental.pallas import tpu as pltpu

_LANE = 128
_CHUNK_MAX = 256                      # rows per inner compute chunk
_BLOCK_BUDGET = 20 * 1024 * 1024      # cap on double-buffered input blocks (fits v7x)
_TARGET_TILE_HBM = 4 * 1024 * 1024    # aim for multi-MiB logits DMA tiles


def _round_up(x, m):
    return ((x + m - 1) // m) * m


def _cdiv(a, b):
    return (a + b - 1) // b


def _accuracy_kernel(yhat_ref, y_ref, out_ref, count_ref, *, chunk, n_chunks):
    """Accumulates #rows where argmax(logits) == label for one (core, tile) step."""
    t = pl.program_id(1)

    @pl.when(t == 0)
    def _init():
        count_ref[...] = jnp.zeros_like(count_ref)

    c = yhat_ref.shape[1]
    # Single (1, C) lane-iota, hoisted out of the chunk loop; broadcast is cheap.
    col_ids = lax.broadcasted_iota(jnp.int32, (1, c), 1)
    big = jnp.int32(jnp.iinfo(jnp.int32).max)

    def body(ci, acc):
        start = pl.multiple_of(ci * chunk, chunk)
        logits = yhat_ref[pl.ds(start, chunk), :]          # (chunk, C), native dtype
        labels = y_ref[pl.ds(start, chunk), :]             # (chunk, 1), int32
        row_max = jnp.max(logits, axis=1, keepdims=True)   # (chunk, 1)
        # First-occurrence argmax (matches torch/jnp tie-breaking): min column
        # index achieving the row max.
        pred = jnp.min(jnp.where(logits == row_max, col_ids, big),
                       axis=1, keepdims=True)              # (chunk, 1), always >= 0
        # Padded / out-of-range rows carry label -1 which pred can never equal,
        # so no explicit row mask is needed.
        correct = (pred == labels).astype(jnp.int32)
        return acc + jnp.sum(correct, axis=0, keepdims=True)

    tile_count = lax.fori_loop(0, n_chunks, body, jnp.zeros((1, 1), jnp.int32))
    count_ref[...] += tile_count

    @pl.when(t == pl.num_programs(1) - 1)
    def _finalize():
        # Lane-dense (8,128) output block; only [0,0] is consumed by the wrapper.
        out_ref[...] = jnp.broadcast_to(count_ref[...], (8, _LANE))


def accuracy(yhat, y, *, max_rows_per_tile=None):
    """yhat: (N, C) float (any dtype), y: (N,) int. Returns scalar accuracy in %."""
    n, c = yhat.shape
    itemsize = jnp.dtype(yhat.dtype).itemsize

    # --- byte-based tile sizing -------------------------------------------
    chunk = min(_CHUNK_MAX, _round_up(n, 32))          # 32 covers f32/bf16/int8 sublanes
    c_pad = _round_up(c, _LANE)
    # VMEM bytes per row for one buffer set: lane-padded logits row + lane-padded
    # (tile,1) int32 label row (512 B).
    row_vmem = c_pad * itemsize + _LANE * 4
    row_hbm = c * itemsize + 4

    try:
        vmem_cap = int(pltpu.get_tpu_info().vmem_capacity_bytes)
    except Exception:
        vmem_cap = 64 * 1024 * 1024                    # conservative (v7x) fallback
    block_budget = min(_BLOCK_BUDGET, vmem_cap // 3)

    tile = min(block_budget // (2 * row_vmem), _TARGET_TILE_HBM // row_hbm)
    tile = max(chunk, (tile // chunk) * chunk)
    tile = min(tile, _round_up(n, chunk))
    if max_rows_per_tile is not None:
        tile = max(chunk, min(tile, (max_rows_per_tile // chunk) * chunk))
    n_chunks = tile // chunk

    # --- grid: (cores, tiles per core) ------------------------------------
    total_tiles = _cdiv(n, tile)
    num_cores = 2 if total_tiles >= 2 else 1           # uses both TCs on v7x; harmless on 1-TC chips
    tiles_per_core = _cdiv(total_tiles, num_cores)
    padded_rows = num_cores * tiles_per_core * tile

    # Pad labels once with an impossible label (-1); removes in-kernel masking.
    y_pad = jnp.full((padded_rows, 1), -1, dtype=jnp.int32)
    y_pad = y_pad.at[:n, 0].set(y.astype(jnp.int32))

    def logits_map(g, t):
        # Clamp phantom tiles (odd tile count split across cores) onto the last
        # real tile; their labels are all -1 so they contribute zero.
        return (jnp.minimum(g * tiles_per_core + t, total_tiles - 1), 0)

    def labels_map(g, t):
        return (g * tiles_per_core + t, 0)

    vmem_limit = max(16 * 1024 * 1024,
                     min((3 * vmem_cap) // 4, 2 * block_budget + 8 * 1024 * 1024))

    kernel = functools.partial(_accuracy_kernel, chunk=chunk, n_chunks=n_chunks)

    counts = pl.pallas_call(
        kernel,
        out_shape=jax.ShapeDtypeStruct((num_cores, 8, _LANE), jnp.int32),
        grid_spec=pltpu.PrefetchScalarGridSpec(
            num_scalar_prefetch=0,
            grid=(num_cores, tiles_per_core),
            in_specs=[
                pl.BlockSpec((tile, c), logits_map),      # logits tile (native dtype)
                pl.BlockSpec((tile, 1), labels_map),      # padded int32 labels
            ],
            out_specs=pl.BlockSpec((None, 8, _LANE), lambda g, t: (g, 0, 0)),
            scratch_shapes=[pltpu.VMEM((1, 1), jnp.int32)],
        ),
        compiler_params=pltpu.CompilerParams(
            dimension_semantics=("parallel", "arbitrary"),
            vmem_limit_bytes=int(vmem_limit),
        ),
        cost_estimate=pl.CostEstimate(
            flops=4 * n * c,
            transcendentals=0,
            bytes_accessed=n * c * itemsize + padded_rows * 4
            + num_cores * 8 * _LANE * 4,
        ),
    )(yhat, y_pad)

    total_correct = counts[:, 0, 0].sum()
    # TODO(synk): original module calls .cpu().numpy().item(); here we return a
    # JAX scalar and let the caller host-transfer if desired.
    return total_correct.astype(jnp.float32) * (100.0 / n)


def _reference(yhat, y):
    return 100.0 * jnp.mean((jnp.argmax(yhat, axis=1) == y).astype(jnp.float32))


if __name__ == "__main__":
    key = jax.random.PRNGKey(0)
    k1, k2, k3, k4, k5, k6 = jax.random.split(key, 6)

    # Test 1: float32 logits, single tile.
    N1, C1 = 64, 32
    yhat1 = jax.random.normal(k1, (N1, C1), dtype=jnp.float32)
    y1 = jax.random.randint(k2, (N1,), 0, C1, dtype=jnp.int32)
    res1 = jax.block_until_ready(accuracy(yhat1, y1))
    ref1 = _reference(yhat1, y1)
    assert abs(float(res1) - float(ref1)) < 1e-4, (float(res1), float(ref1))

    # Test 2: bf16 logits streamed in native dtype, N not sublane-aligned
    # (exercises the -1 label padding for the partial tile).
    N2, C2 = 20, 32
    yhat2 = jax.random.normal(k3, (N2, C2), dtype=jnp.float32).astype(jnp.bfloat16)
    y2 = jax.random.randint(k4, (N2,), 0, C2, dtype=jnp.int32)
    res2 = jax.block_until_ready(accuracy(yhat2, y2))
    ref2 = _reference(yhat2, y2)
    assert abs(float(res2) - float(ref2)) < 1e-4, (float(res2), float(ref2))

    # Test 3: multi-tile + 2-way core split with an odd tile count
    # (exercises the phantom-tile clamp and per-core partial counts).
    N3, C3 = 1200, 32
    yhat3 = jax.random.normal(k5, (N3, C3), dtype=jnp.float32)
    y3 = jax.random.randint(k6, (N3,), 0, C3, dtype=jnp.int32)
    res3 = jax.block_until_ready(accuracy(yhat3, y3, max_rows_per_tile=256))
    ref3 = _reference(yhat3, y3)
    assert abs(float(res3) - float(ref3)) < 1e-4, (float(res3), float(ref3))

    print("KERNEL_OK")
</pallas_src>

<mosaic_0001>
module attributes {stable_mosaic.version = 11 : i64} {
  func.func @_accuracy_kernel(%arg0: i32, %arg1: i32, %arg2: memref<64x32xf32, #tpu.memory_space<vmem>>, %arg3: memref<64x1xi32, #tpu.memory_space<vmem>>, %arg4: memref<1x8x128xi32, #tpu.memory_space<vmem>>, %arg5: memref<1x1xi32, #tpu.memory_space<vmem>>) attributes {dimension_semantics = [#tpu.dimension_semantics<parallel>, #tpu.dimension_semantics<arbitrary>], iteration_bounds = array<i64: 1, 1>, scalar_prefetch = 0 : i64, scratch_operands = 1 : i64, tpu.core_type = #tpu.core_type<tc>, window_params = [{transform_indices = @transform_0, window_bounds = array<i64: 64, 32>}, {transform_indices = @transform_1, window_bounds = array<i64: 64, 1>}, {transform_indices = @transform_2, window_bounds = array<i64: 1, 8, 128>}]} {
    %c0_i32 = arith.constant 0 : i32
    %0 = arith.cmpi eq, %arg1, %c0_i32 : i32
    %1 = arith.extui %0 : i1 to i32
    %c0_i32_0 = arith.constant 0 : i32
    %2 = arith.cmpi ne, %1, %c0_i32_0 : i32
    scf.if %2 {
      %c0_i32_12 = arith.constant 0 : i32
      %32 = vector.broadcast %c0_i32_12 : i32 to vector<1x1xi32>
      %c0_13 = arith.constant 0 : index
      %c0_14 = arith.constant 0 : index
      %33 = vector.load %arg5[%c0_13, %c0_14] : memref<1x1xi32, #tpu.memory_space<vmem>>, vector<1x1xi32>
      tpu.vector_store %arg5[%c0_13, %c0_14], %32 {strides = array<i32>} : memref<1x1xi32, #tpu.memory_space<vmem>>, vector<1x1xi32>,
    } else {
    }
    %3 = tpu.iota {dimensions = array<i32: 1>} : vector<1x32xi32>
    %c0_i32_1 = arith.constant 0 : i32
    %4 = vector.broadcast %c0_i32_1 : i32 to vector<1x1xi32>
    %c2147483647_i32 = arith.constant 2147483647 : i32
    %c0_i32_2 = arith.constant 0 : i32
    %c64_i32 = arith.constant 64 : i32
    %5 = arith.muli %c0_i32_2, %c64_i32 : i32
    %6 = tpu.assume_multiple %5, 64 : i32
    %7 = arith.index_cast %6 : i32 to index
    %c0 = arith.constant 0 : index
    %8 = vector.load %arg2[%7, %c0] : memref<64x32xf32, #tpu.memory_space<vmem>>, vector<64x32xf32>
    %9 = arith.index_cast %6 : i32 to index
    %c0_3 = arith.constant 0 : index
    %10 = vector.load %arg3[%9, %c0_3] : memref<64x1xi32, #tpu.memory_space<vmem>>, vector<64x1xi32>
    %cst = arith.constant dense<0xFF800000> : vector<64xf32>
    %11 = vector.multi_reduction <maximumf>, %8, %cst [1] : vector<64x32xf32> to vector<64xf32>
    %12 = vector.shape_cast %11 : vector<64xf32> to vector<64x1xf32>
    %13 = vector.broadcast %12 : vector<64x1xf32> to vector<64x32xf32>
    %14 = arith.cmpf oeq, %8, %13 : vector<64x32xf32>
    %15 = vector.shape_cast %3 : vector<1x32xi32> to vector<1x32xi32>
    %16 = vector.broadcast %15 : vector<1x32xi32> to vector<64x32xi32>
    %17 = vector.broadcast %c2147483647_i32 : i32 to vector<64x32xi32>
    %18 = arith.select %14, %16, %17 : vector<64x32xi1>, vector<64x32xi32>
    %cst_4 = arith.constant dense<2147483647> : vector<64xi32>
    %19 = vector.multi_reduction <minsi>, %18, %cst_4 [1] : vector<64x32xi32> to vector<64xi32>
    %20 = vector.shape_cast %19 : vector<64xi32> to vector<64x1xi32>
    %21 = arith.cmpi eq, %20, %10 : vector<64x1xi32>
    %22 = arith.extui %21 : vector<64x1xi1> to vector<64x1xi32>
    %cst_5 = arith.constant dense<0> : vector<1xi32>
    %23 = vector.multi_reduction <add>, %22, %cst_5 [0] : vector<64x1xi32> to vector<1xi32>
    %24 = vector.shape_cast %23 : vector<1xi32> to vector<1x1xi32>
    %25 = arith.addi %4, %24 : vector<1x1xi32>
    %c1_i32 = arith.constant 1 : i32
    %c0_6 = arith.constant 0 : index
    %c0_7 = arith.constant 0 : index
    %26 = vector.load %arg5[%c0_6, %c0_7] : memref<1x1xi32, #tpu.memory_space<vmem>>, vector<1x1xi32>
    %27 = arith.addi %26, %25 : vector<1x1xi32>
    %c0_8 = arith.constant 0 : index
    %c0_9 = arith.constant 0 : index
    %28 = vector.load %arg5[%c0_8, %c0_9] : memref<1x1xi32, #tpu.memory_space<vmem>>, vector<1x1xi32>
    tpu.vector_store %arg5[%c0_8, %c0_9], %27 {strides = array<i32>} : memref<1x1xi32, #tpu.memory_space<vmem>>, vector<1x1xi32>,
    %c0_i32_10 = arith.constant 0 : i32
    %29 = arith.cmpi eq, %arg1, %c0_i32_10 : i32
    %30 = arith.extui %29 : i1 to i32
    %c0_i32_11 = arith.constant 0 : i32
    %31 = arith.cmpi ne, %30, %c0_i32_11 : i32
    scf.if %31 {
      %c0_12 = arith.constant 0 : index
      %c0_13 = arith.constant 0 : index
      %32 = vector.load %arg5[%c0_12, %c0_13] : memref<1x1xi32, #tpu.memory_space<vmem>>, vector<1x1xi32>
      %33 = vector.shape_cast %32 : vector<1x1xi32> to vector<1x1xi32>
      %34 = vector.broadcast %33 : vector<1x1xi32> to vector<8x128xi32>
      %c0_14 = arith.constant 0 : index
      %c0_15 = arith.constant 0 : index
      %c0_16 = arith.constant 0 : index
      %35 = vector.load %arg4[%c0_14, %c0_15, %c0_16] : memref<1x8x128xi32, #tpu.memory_space<vmem>>, vector<1x8x128xi32>
      %36 = vector.shape_cast %35 : vector<1x8x128xi32> to vector<8x128xi32>
      %37 = vector.shape_cast %34 : vector<8x128xi32> to vector<1x8x128xi32>
      tpu.vector_store %arg4[%c0_14, %c0_15, %c0_16], %37 {strides = array<i32>} : memref<1x8x128xi32, #tpu.memory_space<vmem>>, vector<1x8x128xi32>,
    } else {
    }
    return
  }
  func.func @transform_0(%arg0: i32, %arg1: i32) -> (i32, i32) {
    %c1_i32 = arith.constant 1 : i32
    %0 = arith.muli %arg0, %c1_i32 : i32
    %1 = arith.addi %0, %arg1 : i32
    %c0_i32 = arith.constant 0 : i32
    %2 = arith.minsi %1, %c0_i32 : i32
    %c0_i32_0 = arith.constant 0 : i32
    %c0_i32_1 = arith.constant 0 : i32
    return %2, %c0_i32_0 : i32, i32
  }
  func.func @transform_1(%arg0: i32, %arg1: i32) -> (i32, i32) {
    %c1_i32 = arith.constant 1 : i32
    %0 = arith.muli %arg0, %c1_i32 : i32
    %1 = arith.addi %0, %arg1 : i32
    %c0_i32 = arith.constant 0 : i32
    %c0_i32_0 = arith.constant 0 : i32
    return %1, %c0_i32 : i32, i32
  }
  func.func @transform_2(%arg0: i32, %arg1: i32) -> (i32, i32, i32) {
    %c0_i32 = arith.constant 0 : i32
    %c0_i32_0 = arith.constant 0 : i32
    %c0_i32_1 = arith.constant 0 : i32
    return %arg0, %c0_i32, %c0_i32_0 : i32, i32, i32
  }
}

</mosaic_0001>

<bundles_post_ra>
// kernel: tpu_custom_call.1
= control target key start
LH: loop header
LB: loop body
LE: loop exit
PB: predicated region body
PF: predicated region fallthrough
CT: control target
= control target key end

     0   :  { %vm90_vm0 = vcmask 261120   ;;  %s477_s0 = inlined_call_operand.vmem [shape: f32[64,32], index: 0, kind: input, shape index: {}]   ;;  %s478_s1 = inlined_call_operand.vmem [shape: s32[64,1], index: 1, kind: input, shape index: {}]   ;;  %s479_s2 = inlined_call_operand.hbm [shape: s32[1,8,128], index: 2, kind: output, shape index: {}]  }
   0x1   :  { %v74_v0 = vld [vmem:[%s477_s0] sm:$0xff]  ;;  %v76_v1 = vld [vmem:[%s477_s0 + $0x10] sm:$0xff]  ;;  %v75_v2 = vld [vmem:[%s477_s0 + $0x8] sm:$0xff] }
   0x2   :  { %v91_v3 = vsel %vm90_vm0, %v74_v0, -inf  ;;  %v97_v4 = vsel %vm90_vm0, %v76_v1, -inf  ;;  %v77_v5 = vld [vmem:[%s477_s0 + $0x18] sm:$0xff]  ;;  %v94_v6 = vsel %vm90_vm0, %v75_v2, -inf }
   0x3   :  { %92 = vmax.xlane.f32.xlu0 %v91_v3  ;;  %98 = vmax.xlane.f32.xlu1 %v97_v4  ;;  %v100_v7 = vsel %vm90_vm0, %v77_v5, -inf }
   0x4   :  { %7 = vsyncpa [#allocation4], 0  ;;  %v78_v8 = vld [vmem:[%s477_s0 + $0x20] sm:$0xff]  ;;  %v79_v9 = vld [vmem:[%s477_s0 + $0x28] sm:$0xff]  ;;  %v72_v16 = vlaneseq }
   0x5   :  { %v103_v10 = vsel %vm90_vm0, %v78_v8, -inf  ;;  %v106_v11 = vsel %vm90_vm0, %v79_v9, -inf  ;;  %v80_v12 = vld [vmem:[%s477_s0 + $0x30] sm:$0xff]  ;;  %v81_v13 = vld [vmem:[%s477_s0 + $0x38] sm:$0xff] }
   0x6   :  { %v109_v14 = vsel %vm90_vm0, %v80_v12, -inf  ;;  %v112_v15 = vsel %vm90_vm0, %v81_v13, -inf  ;;  %v73_v17 = vand.u32 127, %v72_v16 }
   0x7   :  { %95 = vmax.xlane.f32.xlu0 %v94_v6  ;;  %101 = vmax.xlane.f32.xlu1 %v100_v7 }
   0xb   :  { %104 = vmax.xlane.f32.xlu0 %v103_v10  ;;  %107 = vmax.xlane.f32.xlu1 %v106_v11 }
   0xf   :  { %110 = vmax.xlane.f32.xlu0 %v109_v14  ;;  %113 = vmax.xlane.f32.xlu1 %v112_v15 }
  0x90   :  { %v93_v18 = vpop.xlane.xlu0 %92  ;;  %v99_v19 = vpop.xlane.xlu1 %98 }
  0x91   :  { %vm115_vm1 = vcmp.eq.f32.partialorder %v74_v0, %v93_v18  ;;  %vm117_vm2 = vcmp.eq.f32.partialorder %v76_v1, %v99_v19 }
  0x92   :  { %v123_v20 = vsel %vm115_vm1, %v73_v17, 2147483647  ;;  %v125_v21 = vsel %vm117_vm2, %v73_v17, 2147483647  ;;  %vm70_vm1 = vcmask 0  }
  0x93   :  { %v131_v22 = vsel %vm90_vm0, %v123_v20, 2147483647  ;;  %v161_v23 = vsel %vm90_vm0, %v125_v21, 2147483647 }
  0x94   :  { %v96_v24 = vpop.xlane.xlu0 %95  ;;  %v102_v25 = vpop.xlane.xlu1 %101  ;;  %v133_v26 = vshra.s32 %v131_v22, 16  ;;  %v163_v27 = vshra.s32 %v161_v23, 16  ;;  %v132_v58 = vand.u32 65535, %v131_v22  ;;  %v162_v62 = vand.u32 65535, %v161_v23 }
  0x95   :  { %vm116_vm3 = vcmp.eq.f32.partialorder %v75_v2, %v96_v24  ;;  %vm118_vm4 = vcmp.eq.f32.partialorder %v77_v5, %v102_v25  ;;  %v359_v25 = vmov 0  }
  0x96   :  { %v124_v28 = vsel %vm116_vm3, %v73_v17, 2147483647  ;;  %v126_v29 = vsel %vm118_vm4, %v73_v17, 2147483647  ;;  %v135_v30 = vcvt.s32.f32 %v133_v26  ;;  %v165_v36 = vcvt.s32.f32 %v163_v27  ;;  %334 = vset.pattern.permute.xlu0 %v359_v25  ;;  %71 = vst.msk [vmem:[#allocation2] sm:$0x1] %vm70_vm1, %v359_v25 }
  0x97   :  { %v146_v31 = vsel %vm90_vm0, %v124_v28, 2147483647  ;;  %v176_v32 = vsel %vm90_vm0, %v126_v29, 2147483647  ;;  %v134_v60 = vcvt.s32.f32 %v132_v58  ;;  %v164_v3 = vcvt.s32.f32 %v162_v62  ;;  %v84_v62 = vld [vmem:[%s478_s1 + $0x10] sm:$0xff] }
  0x98   :  { %v105_v33 = vpop.xlane.xlu0 %104  ;;  %136 = vmin.xlane.f32.xlu0 %v135_v30  ;;  %v108_v34 = vpop.xlane.xlu1 %107  ;;  %v148_v35 = vshra.s32 %v146_v31, 16  ;;  %v178_v37 = vshra.s32 %v176_v32, 16  ;;  %v147_v61 = vand.u32 65535, %v146_v31  ;;  %v177_v4 = vand.u32 65535, %v176_v32 }
  0x99   :  { %vm119_vm5 = vcmp.eq.f32.partialorder %v78_v8, %v105_v33  ;;  %vm120_vm6 = vcmp.eq.f32.partialorder %v79_v9, %v108_v34  ;;  %vm267_vm3 = vcmask 7168  }
  0x9a   :  { %v127_v38 = vsel %vm119_vm5, %v73_v17, 2147483647  ;;  %v128_v39 = vsel %vm120_vm6, %v73_v17, 2147483647  ;;  %v150_v40 = vcvt.s32.f32 %v148_v35  ;;  %v180_v45 = vcvt.s32.f32 %v178_v37 }
  0x9b   :  { %v191_v41 = vsel %vm90_vm0, %v127_v38, 2147483647  ;;  %v206_v42 = vsel %vm90_vm0, %v128_v39, 2147483647  ;;  %v149_v2 = vcvt.s32.f32 %v147_v61  ;;  %v179_v10 = vcvt.s32.f32 %v177_v4  ;;  %v82_v39 = vld [vmem:[%s478_s1] sm:$0xff]  ;;  %v87_v4 = vld [vmem:[%s478_s1 + $0x28] sm:$0xff] }
  0x9c   :  { %v111_v43 = vpop.xlane.xlu0 %110  ;;  %151 = vmin.xlane.f32.xlu1 %v150_v40  ;;  %166 = vmin.xlane.f32.xlu0 %v165_v36  ;;  %v114_v44 = vpop.xlane.xlu1 %113  ;;  %v193_v46 = vshra.s32 %v191_v41, 16  ;;  %v208_v47 = vshra.s32 %v206_v42, 16  ;;  %v192_v5 = vand.u32 65535, %v191_v41 }
  0x9d   :  { %vm121_vm7 = vcmp.eq.f32.partialorder %v80_v12, %v111_v43  ;;  %vm122_vm8 = vcmp.eq.f32.partialorder %v81_v13, %v114_v44  ;;  %v207_v12 = vand.u32 65535, %v206_v42 }
  0x9e   :  { %v129_v48 = vsel %vm121_vm7, %v73_v17, 2147483647  ;;  %v130_v49 = vsel %vm122_vm8, %v73_v17, 2147483647  ;;  %v195_v50 = vcvt.s32.f32 %v193_v46  ;;  %v210_v53 = vcvt.s32.f32 %v208_v47 }
  0x9f   :  { %v221_v51 = vsel %vm90_vm0, %v129_v48, 2147483647  ;;  %v236_v52 = vsel %vm90_vm0, %v130_v49, 2147483647  ;;  %v194_v11 = vcvt.s32.f32 %v192_v5  ;;  %v209_v18 = vcvt.s32.f32 %v207_v12  ;;  %v83_v48 = vld [vmem:[%s478_s1 + $0x8] sm:$0xff]  ;;  %v88_v5 = vld [vmem:[%s478_s1 + $0x30] sm:$0xff] }
  0xa0   :  { %181 = vmin.xlane.f32.xlu1 %v180_v45  ;;  %196 = vmin.xlane.f32.xlu0 %v195_v50  ;;  %v223_v54 = vshra.s32 %v221_v51, 16  ;;  %v238_v55 = vshra.s32 %v236_v52, 16  ;;  %v222_v13 = vand.u32 65535, %v221_v51  ;;  %v237_v20 = vand.u32 65535, %v236_v52  ;;  %v86_v52 = vld [vmem:[%s478_s1 + $0x20] sm:$0xff] }
  0xa2   :  { %v225_v56 = vcvt.s32.f32 %v223_v54  ;;  %v240_v57 = vcvt.s32.f32 %v238_v55  ;;  %v224_v19 = vcvt.s32.f32 %v222_v13  ;;  %v239_v24 = vcvt.s32.f32 %v237_v20 }
  0xa4   :  { %211 = vmin.xlane.f32.xlu1 %v210_v53  ;;  %226 = vmin.xlane.f32.xlu0 %v225_v56 }
  0xa8   :  { %241 = vmin.xlane.f32.xlu1 %v240_v57 }
 0x125   :  { %v137_v59 = vpop.xlane.xlu0 %136 }
 0x126   :  { %vm138_vm9 = vcmp.eq.f32.partialorder %v135_v30, %v137_v59  ;;  %v143_v27 = vcvt.f32.s32 %v137_v59 }
 0x127   :  { %v139_v63 = vsel %vm138_vm9, %v134_v60, inf }
 0x128   :  { %140 = vmin.xlane.f32.xlu0 %v139_v63  ;;  %v144_v31 = vshll.u32 %v143_v27, 16 }
 0x129   :  { %v152_v0 = vpop.xlane.xlu1 %151  ;;  %v416_v1 = vpop.xlane.xlu0 %166 }
 0x12a   :  { %vm153_vm10 = vcmp.eq.f32.partialorder %v150_v40, %v152_v0  ;;  %vm168_vm11 = vcmp.eq.f32.partialorder %v165_v36, %v416_v1  ;;  %v158_v30 = vcvt.f32.s32 %v152_v0  ;;  %v173_v38 = vcvt.f32.s32 %v416_v1 }
 0x12b   :  { %v154_v6 = vsel %vm153_vm10, %v149_v2, inf  ;;  %v169_v7 = vsel %vm168_vm11, %v164_v3, inf  ;;  %v85_v2 = vld [vmem:[%s478_s1 + $0x18] sm:$0xff] }
 0x12c   :  { %155 = vmin.xlane.f32.xlu1 %v154_v6  ;;  %170 = vmin.xlane.f32.xlu0 %v169_v7  ;;  %v159_v37 = vshll.u32 %v158_v30, 16  ;;  %v174_v51 = vshll.u32 %v173_v38, 16 }
 0x12d   :  { %v182_v8 = vpop.xlane.xlu1 %181  ;;  %v197_v9 = vpop.xlane.xlu0 %196 }
 0x12e   :  { %vm183_vm12 = vcmp.eq.f32.partialorder %v180_v45, %v182_v8  ;;  %vm198_vm13 = vcmp.eq.f32.partialorder %v195_v50, %v197_v9  ;;  %v203_v34 = vcvt.f32.s32 %v197_v9  ;;  %v188_v40 = vcvt.f32.s32 %v182_v8 }
 0x12f   :  { %v184_v14 = vsel %vm183_vm12, %v179_v10, inf  ;;  %v199_v15 = vsel %vm198_vm13, %v194_v11, inf }
 0x130   :  { %185 = vmin.xlane.f32.xlu1 %v184_v14  ;;  %200 = vmin.xlane.f32.xlu0 %v199_v15  ;;  %v204_v47 = vshll.u32 %v203_v34, 16 }
 0x131   :  { %v212_v16 = vpop.xlane.xlu1 %211  ;;  %v227_v17 = vpop.xlane.xlu0 %226 }
 0x132   :  { %vm213_vm14 = vcmp.eq.f32.partialorder %v210_v53, %v212_v16  ;;  %vm228_vm15 = vcmp.eq.f32.partialorder %v225_v56, %v227_v17  ;;  %v218_v41 = vcvt.f32.s32 %v212_v16  ;;  %v233_v42 = vcvt.f32.s32 %v227_v17  ;;  %v89_v17 = vld [vmem:[%s478_s1 + $0x38] sm:$0xff]  ;;  %s360_s1 = smov [#allocation3]  }
 0x133   :  { %v214_v21 = vsel %vm213_vm14, %v209_v18, inf  ;;  %v229_v22 = vsel %vm228_vm15, %v224_v19, inf  ;;  %v189_v53 = vshll.u32 %v188_v40, 16  ;;  %v289_v40 = vld [vmem:[#allocation2] sm:$0x1]  ;;  %s311_s12 = sshll.u32 %s360_s1, 4  ;;  %s312_s12 = int_to_ptr.vmem [resolvable:$true] %s311_s12 }
 0x134   :  { %215 = vmin.xlane.f32.xlu1 %v214_v21  ;;  %230 = vmin.xlane.f32.xlu0 %v229_v22  ;;  %v219_v54 = vshll.u32 %v218_v41, 16  ;;  %v234_v55 = vshll.u32 %v233_v42, 16  ;;  %s335_s13 = scalar_lea.vmem %s312_s12, 128  ;;  %p340_p1 = scmp.lt.s32.totalorder %s312_s12, %s312_s12 }
 0x135   :  { %v242_v23 = vpop.xlane.xlu1 %241  ;;  %p336_p0 = scmp.ne.s32.totalorder %s312_s12, %s335_s13  ;;  %p341_p2 = scmp.lt.s32.totalorder %s335_s13, %s335_s13 }
 0x136   :  { %vm243_vm0 = vcmp.eq.f32.partialorder %v240_v57, %v242_v23  ;;  %v248_v57 = vcvt.f32.s32 %v242_v23 }
 0x137   :  { %v244_v26 = vsel %vm243_vm0, %v239_v24, inf  ;;  %p342_p3 = por %p341_p2, %p340_p1 }
 0x138   :  { %245 = vmin.xlane.f32.xlu1 %v244_v26  ;;  %v249_v10 = vshll.u32 %v248_v57, 16 }
 0x139   :  { %p343_p4 = pnand %p342_p3, %p336_p0 }
 0x1b5   :  { %v141_v28 = vpop.xlane.xlu0 %140 }
 0x1b6   :  { %v142_v29 = vcvt.f32.s32 %v141_v28 }
 0x1b8   :  { %v145_v35 = vadd.s32 %v144_v31, %v142_v29 }
 0x1b9   :  { %v156_v32 = vpop.xlane.xlu1 %155  ;;  %v171_v33 = vpop.xlane.xlu0 %170 }
 0x1ba   :  { %v157_v36 = vcvt.f32.s32 %v156_v32  ;;  %v172_v44 = vcvt.f32.s32 %v171_v33  ;;  %vm251_vm2 = vcmp.eq.s32.totalorder %v145_v35, %v82_v39 }
 0x1bb   :  { %v259_v58 = vsel %vm251_vm2, 1, %v359_v25 }
 0x1bc   :  { %v160_v43 = vadd.s32 %v159_v37, %v157_v36  ;;  %v175_v59 = vadd.s32 %v174_v51, %v172_v44  ;;  %v268_v6 = vsel %vm267_vm3, %v259_v58, 0 }
 0x1bd   :  { %v186_v45 = vpop.xlane.xlu1 %185  ;;  %v201_v46 = vpop.xlane.xlu0 %200 }
 0x1be   :  { %v187_v49 = vcvt.f32.s32 %v186_v45  ;;  %v202_v50 = vcvt.f32.s32 %v201_v46  ;;  %vm252_vm4 = vcmp.eq.s32.totalorder %v160_v43, %v83_v48  ;;  %vm253_vm6 = vcmp.eq.s32.totalorder %v175_v59, %v84_v62 }
 0x1bf   :  { %v260_v11 = vsel %vm252_vm4, 1, %v359_v25  ;;  %v261_v21 = vsel %vm253_vm6, 1, %v359_v25 }
 0x1c0   :  { %v205_v56 = vadd.s32 %v204_v47, %v202_v50  ;;  %v190_v63 = vadd.s32 %v189_v53, %v187_v49  ;;  %v269_v18 = vsel %vm267_vm3, %v260_v11, 0  ;;  %v270_v28 = vsel %vm267_vm3, %v261_v21, 0 }
 0x1c1   :  { %v216_v60 = vpop.xlane.xlu1 %215  ;;  %v231_v61 = vpop.xlane.xlu0 %230 }
 0x1c2   :  { %vm255_vm5 = vcmp.eq.s32.totalorder %v205_v56, %v86_v52  ;;  %v217_v0 = vcvt.f32.s32 %v216_v60  ;;  %v232_v1 = vcvt.f32.s32 %v231_v61  ;;  %vm254_vm7 = vcmp.eq.s32.totalorder %v190_v63, %v85_v2 }
 0x1c3   :  { %v263_v3 = vsel %vm255_vm5, 1, %v359_v25  ;;  %v262_v22 = vsel %vm254_vm7, 1, %v359_v25 }
 0x1c4   :  { %v272_v7 = vsel %vm267_vm3, %v263_v3, 0  ;;  %v220_v8 = vadd.s32 %v219_v54, %v217_v0  ;;  %v235_v9 = vadd.s32 %v234_v55, %v232_v1  ;;  %v271_v29 = vsel %vm267_vm3, %v262_v22, 0 }
 0x1c5   :  { %v273_v12 = vadd.s32 %v272_v7, %v268_v6  ;;  %v246_v13 = vpop.xlane.xlu1 %245 }
 0x1c6   :  { %vm256_vm8 = vcmp.eq.s32.totalorder %v220_v8, %v87_v4  ;;  %vm257_vm9 = vcmp.eq.s32.totalorder %v235_v9, %v88_v5  ;;  %v247_v14 = vcvt.f32.s32 %v246_v13 }
 0x1c7   :  { %v264_v15 = vsel %vm256_vm8, 1, %v359_v25  ;;  %v265_v16 = vsel %vm257_vm9, 1, %v359_v25 }
 0x1c8   :  { %v274_v19 = vsel %vm267_vm3, %v264_v15, 0  ;;  %v250_v20 = vadd.s32 %v249_v10, %v247_v14  ;;  %v276_v24 = vsel %vm267_vm3, %v265_v16, 0 }
 0x1c9   :  { %v275_v23 = vadd.s32 %v274_v19, %v269_v18  ;;  %v277_v31 = vadd.s32 %v276_v24, %v270_v28 }
 0x1ca   :  { %vm258_vm10 = vcmp.eq.s32.totalorder %v250_v20, %v89_v17 }
 0x1cb   :  { %v280_v26 = vadd.s32 %v275_v23, %v273_v12  ;;  %v266_v27 = vsel %vm258_vm10, 1, %v359_v25 }
 0x1cc   :  { %v278_v30 = vsel %vm267_vm3, %v266_v27, 0 }
 0x1cd   :  { %v279_v32 = vadd.s32 %v278_v30, %v271_v29 }
 0x1cf   :  { %v281_v33 = vadd.s32 %v279_v32, %v277_v31 }
 0x1d1   :  { %v282_v34 = vadd.s32 %v281_v33, %v280_v26 }
 0x1d3   :  { %v283_v35 = vrot.slane %v282_v34, 4 }
 0x1d5   :  { %v284_v36 = vadd.s32 %v283_v35, %v282_v34 }
 0x1d7   :  { %v285_v37 = vrot.slane %v284_v36, 2 }
 0x1d9   :  { %v286_v38 = vadd.s32 %v285_v37, %v284_v36 }
 0x1db   :  { %v287_v39 = vrot.slane %v286_v38, 1 }
 0x1dd   :  { %v288_v41 = vadd.s32 %v287_v39, %v286_v38 }
 0x1df   :  { %v290_v42 = vadd.s32 %v289_v40, %v288_v41 }
 0x1e1   :  { %292 = vst.msk [vmem:[#allocation2] sm:$0x1] %vm70_vm1, %v290_v42 }
 0x1e8   :  { %v331_v25 = vld [vmem:[#allocation2] ss:$0 sm:$0xff] }
 0x1e9   :  { %302 = vperm.xlu0 %334, %v331_v25  }
 0x268   :  { %v303_v43 = vpop.permute.xlu0 %302 }
 0x269   :  { %304 = vst [vmem:[#allocation3] sm:$0xff] %v303_v43 }
 0x26a   :  { %346 = shalt.err (!%p343_p4)
}
 0x26b   :  { %s347_s16 = scalar_lea.hbm %s479_s2, 128 }
 0x26c   :  { %p348_p5 = scmp.ne.s32.totalorder %s479_s2, %s347_s16  ;;  %p351_p6 = scmp.lt.u32.totalorder %s347_s16, %s479_s2 }
 0x26e   :  { %p353_p7 = pnand %p351_p6, %p348_p5 }
 0x270   :  { %356 = shalt.err (!%p353_p7)
}
 0x271   :  { %314 = dma.vmem_to_hbm [thread:$0]  %s312_s12, 128, %s479_s2, [#allocation4]  }
 0x272   :  { %357 = dma.done.wait [#allocation4], 128  }
 0x273   :  { %358 = vsyncadd [#allocation4], 4294967168 }
 0x274   :  { %318 = vsyncpa [#allocation4], 1 }

</bundles_post_ra>
